<compile_context>
chip_gen: v7x
topology: tpu7x:2x2x1
jax: 0.10.0
libtpu: 0.0.40
codegen_flags: <defaults>
</compile_context>

<pallas_src>
import jax
import jax.numpy as jnp
from jax.experimental import pallas as pl
from jax.experimental.pallas import tpu as pltpu


def _round_up(n, m):
    return ((n + m - 1) // m) * m


def _tensorcores_per_chip():
    """Best-effort TensorCore-per-chip count (2 on v7x and v4/v5p megacore)."""
    try:
        kind = getattr(jax.devices()[0], "device_kind", "").lower()
    except Exception:
        return 1
    if "v7" in kind or "7x" in kind:
        return 2
    if "v4" in kind or "v5p" in kind:
        return 2
    return 1


# ----------------------------- kernel -------------------------------------- #

def _mlp_kernel(x_ref, w1_ref, w2_ref, w34_ref, bias_ref, o_ref):
    """Fused MLP: (Linear+ReLU) x2, then one fused Linear for layers 3+4."""
    Hp = w1_ref.shape[1]          # hidden width (padded to 128)
    Cp = w34_ref.shape[1]         # class width  (padded to 128)

    x = x_ref[...]                # bf16 (tb, F) — feature axis unpadded
    biases = bias_ref[...]        # f32  (8, W)  — rows 0/1/2 = b1 / b2 / b34
    b1 = biases[0:1, :Hp]
    b2 = biases[1:2, :Hp]
    b34 = biases[2:3, :Cp]

    # Layer 1: Linear + ReLU (bf16 operands, f32 MXU accumulation, f32 VPU math)
    h = jnp.dot(x, w1_ref[...], preferred_element_type=jnp.float32) + b1
    h = jnp.maximum(h, 0.0).astype(x.dtype)

    # Layer 2: Linear + ReLU
    h = jnp.dot(h, w2_ref[...], preferred_element_type=jnp.float32) + b2
    h = jnp.maximum(h, 0.0).astype(x.dtype)

    # Layers 3+4 fused (no activation between them in the reference module)
    h = jnp.dot(h, w34_ref[...], preferred_element_type=jnp.float32) + b34

    o_ref[...] = h.astype(o_ref.dtype)


# --------------------- one-time parameter preparation ---------------------- #

def prepare_params(params, *, compute_dtype=jnp.bfloat16):
    """Hoisted per-call work: fuse layers 3+4, pad, cast, stack biases. Run once."""
    (w1, b1), (w2, b2), (w3, b3), (w4, b4) = params
    F = w1.shape[0]
    C = w4.shape[1]

    # Exact algebraic fusion of layers 3 & 4 (intentional numerics change only
    # through bf16 rounding of the fused weight).
    w34 = jnp.dot(w3, w4)          # (F, C)
    b34 = jnp.dot(b3, w4) + b4     # (1, C)

    Hp = _round_up(F, 128)         # hidden width, lane-dense
    Cp = _round_up(C, 128)         # class width, lane-dense
    W = max(Hp, Cp)

    def pad2(a, rows, cols, dtype):
        return jnp.pad(a, ((0, rows - a.shape[0]), (0, cols - a.shape[1]))).astype(dtype)

    w1p = pad2(w1, F, Hp, compute_dtype)     # (F, Hp)  input-feature dim left unpadded
    w2p = pad2(w2, Hp, Hp, compute_dtype)    # (Hp, Hp)
    w34p = pad2(w34, Hp, Cp, compute_dtype)  # (Hp, Cp)

    # Single stacked f32 bias operand: one DMA / one (8,128) VMEM buffer.
    biases = jnp.zeros((8, W), jnp.float32)
    biases = biases.at[0, :F].set(b1[0])
    biases = biases.at[1, :F].set(b2[0])
    biases = biases.at[2, :C].set(b34[0])

    return {
        "w1": w1p, "w2": w2p, "w34": w34p, "biases": biases,
        "n_features": F, "n_classes": C, "Hp": Hp, "Cp": Cp,
        "compute_dtype": compute_dtype,
    }


# ------------------------------ forward ------------------------------------ #

def logistic_regression_forward(x, prepared, *, max_tile=2048):
    """Pallas forward matching LogisticRegression(n_features, n_classes)."""
    F = prepared["n_features"]
    C = prepared["n_classes"]
    Cp = prepared["Cp"]
    w1p, w2p, w34p = prepared["w1"], prepared["w2"], prepared["w34"]
    biases = prepared["biases"]
    cdt = prepared["compute_dtype"]

    B = x.shape[0]
    assert x.shape[1] == F

    # One batch tile per TensorCore; more steps only for very large batches.
    n_cores = _tensorcores_per_chip()
    B8 = _round_up(max(B, 1), 8)
    steps = max(n_cores, pl.cdiv(B8, max_tile))
    if steps % n_cores:
        steps += n_cores - (steps % n_cores)       # balance across TCs
    steps = max(min(steps, B8 // 8), 1)            # never split below 8-row tiles
    tb = _round_up(pl.cdiv(B8, steps), 8)
    Bp = tb * steps

    # Per-call preprocessing of x only: pad batch rows + cast to bf16.
    # NOTE: padded batch rows compute relu(b1)-derived values that are discarded
    # by the final slice; any future in-kernel batch reduction must mask them.
    xp = jnp.pad(x, ((0, Bp - B), (0, 0))).astype(cdt)

    # VMEM budget: weights (resident) + double-buffered x/out tiles, with headroom.
    w_bytes = (w1p.size + w2p.size + w34p.size) * jnp.dtype(cdt).itemsize + biases.size * 4
    s_bytes = 2 * (tb * F * jnp.dtype(cdt).itemsize + tb * Cp * jnp.dtype(x.dtype).itemsize)
    vmem_limit = int(min(max(4 * (w_bytes + s_bytes), 8 << 20), 48 << 20))

    def full_spec(a):
        # Grid-invariant operand: DMA'd once, stays resident across grid steps.
        return pl.BlockSpec(a.shape, lambda i: (0, 0))

    out_padded = pl.pallas_call(
        _mlp_kernel,
        out_shape=jax.ShapeDtypeStruct((Bp, Cp), x.dtype),
        grid_spec=pltpu.PrefetchScalarGridSpec(
            num_scalar_prefetch=0,
            grid=(steps,),
            in_specs=[
                pl.BlockSpec((tb, F), lambda i: (i, 0)),   # full-extent (unpadded) feature dim
                full_spec(w1p),
                full_spec(w2p),
                full_spec(w34p),
                full_spec(biases),
            ],
            out_specs=pl.BlockSpec((tb, Cp), lambda i: (i, 0)),
        ),
        compiler_params=pltpu.CompilerParams(
            dimension_semantics=("parallel",),   # batch tiles shardable across TCs
            vmem_limit_bytes=vmem_limit,
        ),
    )(xp, w1p, w2p, w34p, biases)

    return out_padded[:B, :C]


# ------------------------------ init / refs -------------------------------- #

def init_params(key, n_features, n_classes):
    """Deterministic init mimicking nn.Linear's U(-1/sqrt(in), 1/sqrt(in))."""
    dims = [(n_features, n_features),
            (n_features, n_features),
            (n_features, 128),
            (128, n_classes)]
    params = []
    for (fan_in, fan_out) in dims:
        key, kw, kb = jax.random.split(key, 3)
        bound = 1.0 / jnp.sqrt(fan_in)
        w = jax.random.uniform(kw, (fan_in, fan_out), jnp.float32, -bound, bound)
        b = jax.random.uniform(kb, (1, fan_out), jnp.float32, -bound, bound)
        params.append((w, b))
    return params


def reference_forward(x, params):
    """Plain f32 JAX reference (PyTorch-equivalent math)."""
    (w1, b1), (w2, b2), (w3, b3), (w4, b4) = params
    h = jnp.maximum(x @ w1 + b1, 0.0)
    h = jnp.maximum(h @ w2 + b2, 0.0)
    h = h @ w3 + b3
    h = h @ w4 + b4
    return h


def reference_forward_bf16(x, params):
    """Reference using the kernel's bf16-operand / f32-accumulate math and 3+4 fusion."""
    (w1, b1), (w2, b2), (w3, b3), (w4, b4) = params
    w34 = jnp.dot(w3, w4)
    b34 = jnp.dot(b3, w4) + b4
    h = jnp.dot(x.astype(jnp.bfloat16), w1.astype(jnp.bfloat16),
                preferred_element_type=jnp.float32) + b1
    h = jnp.maximum(h, 0.0).astype(jnp.bfloat16)
    h = jnp.dot(h, w2.astype(jnp.bfloat16),
                preferred_element_type=jnp.float32) + b2
    h = jnp.maximum(h, 0.0).astype(jnp.bfloat16)
    h = jnp.dot(h, w34.astype(jnp.bfloat16),
                preferred_element_type=jnp.float32) + b34
    return h


if __name__ == "__main__":
    key = jax.random.PRNGKey(0)
    n_features = 32
    n_classes = 10
    batch = 16   # small example batch

    key, kx = jax.random.split(key)
    x = jax.random.normal(kx, (batch, n_features), dtype=jnp.float32)
    params = init_params(key, n_features, n_classes)

    # One-time parameter prep (fusion / padding / casts hoisted out of the forward path).
    prepared = prepare_params(params)

    # Per-call path (cast x -> pallas_call -> slice) compiled as a single program.
    fwd = jax.jit(lambda xx: logistic_regression_forward(xx, prepared))
    out = jax.block_until_ready(fwd(x))
    assert out.shape == (batch, n_classes)

    # Tight check vs a reference with the same bf16 casts / layer-3+4 fusion.
    ref_bf16 = reference_forward_bf16(x, params)
    assert jnp.allclose(out, ref_bf16, atol=5e-3, rtol=5e-3), "mismatch vs bf16 reference"

    # End-to-end check vs the plain f32 reference (tolerance sized for bf16 operands).
    ref_f32 = reference_forward(x, params)
    assert jnp.allclose(out, ref_f32, atol=5e-2, rtol=5e-2), "mismatch vs f32 reference"

    print("KERNEL_OK")
</pallas_src>

<mosaic_0001>
module attributes {stable_mosaic.version = 11 : i64} {
  func.func @_mlp_kernel(%arg0: i32, %arg1: memref<16x32xbf16, #tpu.memory_space<vmem>>, %arg2: memref<32x128xbf16, #tpu.memory_space<vmem>>, %arg3: memref<128x128xbf16, #tpu.memory_space<vmem>>, %arg4: memref<128x128xbf16, #tpu.memory_space<vmem>>, %arg5: memref<8x128xf32, #tpu.memory_space<vmem>>, %arg6: memref<16x128xf32, #tpu.memory_space<vmem>>) attributes {dimension_semantics = [#tpu.dimension_semantics<parallel>], iteration_bounds = array<i64: 1>, scalar_prefetch = 0 : i64, scratch_operands = 0 : i64, tpu.core_type = #tpu.core_type<tc>, window_params = [{transform_indices = @transform_0, window_bounds = array<i64: 16, 32>}, {pipeline_mode = #tpu.pipeline_mode<synchronous>, transform_indices = @transform_1, window_bounds = array<i64: 32, 128>}, {pipeline_mode = #tpu.pipeline_mode<synchronous>, transform_indices = @transform_2, window_bounds = array<i64: 128, 128>}, {pipeline_mode = #tpu.pipeline_mode<synchronous>, transform_indices = @transform_3, window_bounds = array<i64: 128, 128>}, {pipeline_mode = #tpu.pipeline_mode<synchronous>, transform_indices = @transform_4, window_bounds = array<i64: 8, 128>}, {transform_indices = @transform_5, window_bounds = array<i64: 16, 128>}]} {
    %c0 = arith.constant 0 : index
    %c0_0 = arith.constant 0 : index
    %0 = vector.load %arg1[%c0, %c0_0] : memref<16x32xbf16, #tpu.memory_space<vmem>>, vector<16x32xbf16>
    %c0_1 = arith.constant 0 : index
    %c0_2 = arith.constant 0 : index
    %1 = vector.load %arg5[%c0_1, %c0_2] : memref<8x128xf32, #tpu.memory_space<vmem>>, vector<8x128xf32>
    %2 = vector.extract_strided_slice %1 {offsets = [0, 0], sizes = [1, 128], strides = [1, 1]} : vector<8x128xf32> to vector<1x128xf32>
    %3 = vector.extract_strided_slice %1 {offsets = [1, 0], sizes = [1, 128], strides = [1, 1]} : vector<8x128xf32> to vector<1x128xf32>
    %4 = vector.extract_strided_slice %1 {offsets = [2, 0], sizes = [1, 128], strides = [1, 1]} : vector<8x128xf32> to vector<1x128xf32>
    %c0_3 = arith.constant 0 : index
    %c0_4 = arith.constant 0 : index
    %5 = vector.load %arg2[%c0_3, %c0_4] : memref<32x128xbf16, #tpu.memory_space<vmem>>, vector<32x128xbf16>
    %cst = arith.constant dense<0.000000e+00> : vector<16x128xf32>
    %6 = tpu.matmul %0, %5, %cst {dimension_numbers = #tpu.dot_dimension_numbers<[1], [0], [0], [1], [0, 0, 1, 1], [], []>} : vector<16x32xbf16>, vector<32x128xbf16>, vector<16x128xf32> -> vector<16x128xf32>
    %7 = vector.broadcast %2 : vector<1x128xf32> to vector<16x128xf32>
    %8 = arith.addf %6, %7 : vector<16x128xf32>
    %cst_5 = arith.constant 0.000000e+00 : f32
    %9 = vector.broadcast %cst_5 : f32 to vector<16x128xf32>
    %10 = arith.maximumf %8, %9 : vector<16x128xf32>
    %11 = arith.truncf %10 : vector<16x128xf32> to vector<16x128xbf16>
    %c0_6 = arith.constant 0 : index
    %c0_7 = arith.constant 0 : index
    %12 = vector.load %arg3[%c0_6, %c0_7] : memref<128x128xbf16, #tpu.memory_space<vmem>>, vector<128x128xbf16>
    %cst_8 = arith.constant dense<0.000000e+00> : vector<16x128xf32>
    %13 = tpu.matmul %11, %12, %cst_8 {dimension_numbers = #tpu.dot_dimension_numbers<[1], [0], [0], [1], [0, 0, 1, 1], [], []>} : vector<16x128xbf16>, vector<128x128xbf16>, vector<16x128xf32> -> vector<16x128xf32>
    %14 = vector.broadcast %3 : vector<1x128xf32> to vector<16x128xf32>
    %15 = arith.addf %13, %14 : vector<16x128xf32>
    %cst_9 = arith.constant 0.000000e+00 : f32
    %16 = vector.broadcast %cst_9 : f32 to vector<16x128xf32>
    %17 = arith.maximumf %15, %16 : vector<16x128xf32>
    %18 = arith.truncf %17 : vector<16x128xf32> to vector<16x128xbf16>
    %c0_10 = arith.constant 0 : index
    %c0_11 = arith.constant 0 : index
    %19 = vector.load %arg4[%c0_10, %c0_11] : memref<128x128xbf16, #tpu.memory_space<vmem>>, vector<128x128xbf16>
    %cst_12 = arith.constant dense<0.000000e+00> : vector<16x128xf32>
    %20 = tpu.matmul %18, %19, %cst_12 {dimension_numbers = #tpu.dot_dimension_numbers<[1], [0], [0], [1], [0, 0, 1, 1], [], []>} : vector<16x128xbf16>, vector<128x128xbf16>, vector<16x128xf32> -> vector<16x128xf32>
    %21 = vector.broadcast %4 : vector<1x128xf32> to vector<16x128xf32>
    %22 = arith.addf %20, %21 : vector<16x128xf32>
    %c0_13 = arith.constant 0 : index
    %c0_14 = arith.constant 0 : index
    %23 = vector.load %arg6[%c0_13, %c0_14] : memref<16x128xf32, #tpu.memory_space<vmem>>, vector<16x128xf32>
    tpu.vector_store %arg6[%c0_13, %c0_14], %22 {strides = array<i32>} : memref<16x128xf32, #tpu.memory_space<vmem>>, vector<16x128xf32>,
    return
  }
  func.func @transform_0(%arg0: i32) -> (i32, i32) {
    %c0_i32 = arith.constant 0 : i32
    %c0_i32_0 = arith.constant 0 : i32
    return %arg0, %c0_i32 : i32, i32
  }
  func.func @transform_1(%arg0: i32) -> (i32, i32) {
    %c0_i32 = arith.constant 0 : i32
    %c0_i32_0 = arith.constant 0 : i32
    %c0_i32_1 = arith.constant 0 : i32
    return %c0_i32, %c0_i32_0 : i32, i32
  }
  func.func @transform_2(%arg0: i32) -> (i32, i32) {
    %c0_i32 = arith.constant 0 : i32
    %c0_i32_0 = arith.constant 0 : i32
    %c0_i32_1 = arith.constant 0 : i32
    return %c0_i32, %c0_i32_0 : i32, i32
  }
  func.func @transform_3(%arg0: i32) -> (i32, i32) {
    %c0_i32 = arith.constant 0 : i32
    %c0_i32_0 = arith.constant 0 : i32
    %c0_i32_1 = arith.constant 0 : i32
    return %c0_i32, %c0_i32_0 : i32, i32
  }
  func.func @transform_4(%arg0: i32) -> (i32, i32) {
    %c0_i32 = arith.constant 0 : i32
    %c0_i32_0 = arith.constant 0 : i32
    %c0_i32_1 = arith.constant 0 : i32
    return %c0_i32, %c0_i32_0 : i32, i32
  }
  func.func @transform_5(%arg0: i32) -> (i32, i32) {
    %c0_i32 = arith.constant 0 : i32
    %c0_i32_0 = arith.constant 0 : i32
    return %arg0, %c0_i32 : i32, i32
  }
}

</mosaic_0001>

<bundles_post_ra>
// kernel: _lambda_.1
= control target key start
LH: loop header
LB: loop body
LE: loop exit
PB: predicated region body
PF: predicated region fallthrough
CT: control target
= control target key end

     0   :  { %10 = vsyncpa [#allocation3], 0  ;;  %s667_s0 = inlined_call_operand.vmem [shape: bf16[16,32], index: 0, kind: input, shape index: {}]   ;;  %s668_s1 = inlined_call_operand.vmem [shape: bf16[32,128], index: 1, kind: input, shape index: {}]   ;;  %s669_s2 = inlined_call_operand.hbm [shape: bf16[128,128], index: 2, kind: input, shape index: {}]   ;;  %s670_s3 = inlined_call_operand.hbm [shape: bf16[128,128], index: 3, kind: input, shape index: {}]   ;;  %s671_s4 = inlined_call_operand.vmem [shape: f32[8,128], index: 4, kind: input, shape index: {}]   ;;  %s672_s5 = inlined_call_operand.hbm [shape: f32[16,128], index: 5, kind: output, shape index: {}]  }
   0x1   :  { %11 = vsyncpa [#allocation6], 0 }
   0x2   :  { %12 = vsyncpa [#allocation4], 0  ;;  %s556_s18 = smov [#allocation2]   ;;  %s484_s22 = scalar_lea.hbm %s669_s2, 1024 }
   0x3   :  { %s22_s19 = sshll.u32 %s556_s18, 4  ;;  %p485_p0 = scmp.ne.s32.totalorder %s669_s2, %s484_s22  ;;  %s23_s19 = int_to_ptr.vmem [resolvable:$true] %s22_s19 }
   0x4   :  { %p488_p1 = scmp.lt.u32.totalorder %s484_s22, %s669_s2 }
   0x6   :  { %p490_p2 = pnand %p488_p1, %p485_p0 }
   0x8   :  { %493 = shalt.err (!%p490_p2)
}
   0x9   :  { %s494_s27 = scalar_lea.vmem %s23_s19, 1024  ;;  %p499_p4 = scmp.lt.s32.totalorder %s23_s19, %s23_s19 }
   0xa   :  { %p495_p3 = scmp.ne.s32.totalorder %s23_s19, %s494_s27  ;;  %p500_p5 = scmp.lt.s32.totalorder %s494_s27, %s494_s27 }
   0xc   :  { %p501_p6 = por %p500_p5, %p499_p4 }
   0xe   :  { %p502_p7 = pnand %p501_p6, %p495_p3 }
  0x10   :  { %505 = shalt.err (!%p502_p7)
}
  0x11   :  { %s557_s28 = smov 64   ;;  %s558_s29 = smov 4  }
  0x12   :  { %28 = dma.hbm_to_vmem [thread:$0]  %s669_s2, 1024, %s23_s19, [#allocation3], %s557_s28, %s557_s28, %s558_s29  }
  0x13   :  { %s559_s7 = smov [#allocation5]   ;;  %s506_s11 = scalar_lea.hbm %s670_s3, 1024 }
  0x14   :  { %s34_s8 = sshll.u32 %s559_s7, 4  ;;  %p507_p8 = scmp.ne.s32.totalorder %s670_s3, %s506_s11  ;;  %s35_s8 = int_to_ptr.vmem [resolvable:$true] %s34_s8 }
  0x15   :  { %p510_p9 = scmp.lt.u32.totalorder %s506_s11, %s670_s3 }
  0x17   :  { %p512_p10 = pnand %p510_p9, %p507_p8 }
  0x19   :  { %515 = shalt.err (!%p512_p10)
}
  0x1a   :  { %s516_s16 = scalar_lea.vmem %s35_s8, 1024  ;;  %p521_p12 = scmp.lt.s32.totalorder %s35_s8, %s35_s8 }
  0x1b   :  { %p517_p11 = scmp.ne.s32.totalorder %s35_s8, %s516_s16  ;;  %p522_p13 = scmp.lt.s32.totalorder %s516_s16, %s516_s16 }
  0x1d   :  { %p523_p0 = por %p522_p13, %p521_p12 }
  0x1f   :  { %p524_p1 = pnand %p523_p0, %p517_p11 }
  0x21   :  { %527 = shalt.err (!%p524_p1)
}
  0x22   :  { %40 = dma.hbm_to_vmem [thread:$0]  %s670_s3, 1024, %s35_s8, [#allocation6], %s557_s28, %s557_s28, %s558_s29  }
  0x23   :  { %550 = dma.done.wait [#allocation3], 1024  }
  0x24   :  { %551 = vsyncadd [#allocation3], 4294966272 }
  0x25   :  { %552 = dma.done.wait [#allocation6], 1024  }
  0x26   :  { %553 = vsyncadd [#allocation6], 4294966272  ;;  %v560_v0 = vmov 0.0   ;;  %vm561_vm0 = vmmov 0   ;;  %v465_v1 = vld [vmem:[%s668_s1] sm:$0xff]   ;;  %v466_v2 = vld [vmem:[%s668_s1 + $0x8] sm:$0xff]   ;;  %v57_v18 = vlaneseq }
  0x27   :  { %408 = vmatprep.subr.bf16.mxu0 %v560_v0  ;;  %412 = vmatprep.mubr.msk.bf16.mxu0 %vm561_vm0, %v560_v0  ;;  %v468_v3 = vld [vmem:[#allocation2] sm:$0xff]   ;;  %v469_v5 = vld [vmem:[#allocation2 + $0x8] sm:$0xff]   ;;  %vm78_vm1 = vcmask 261120   ;;  %v470_v6 = vld [vmem:[#allocation2 + $0x10] sm:$0xff]  }
  0x28   :  { %416 = vmatprep.subr.bf16.mxu1 %v560_v0  ;;  %432 = vmatprep.mubr.msk.bf16.mxu1 %vm561_vm0, %v560_v0  ;;  %v467_v4 = vld [vmem:[%s667_s0] sm:$0xff]   ;;  %v471_v7 = vld [vmem:[#allocation2 + $0x18] sm:$0xff]   ;;  %v473_v9 = vld [vmem:[#allocation2 + $0x28] sm:$0xff]   ;;  %v58_v19 = vshrl.u32 %v57_v18, 7 }
  0x29   :  { %409 = vmatpush3.bf16.msra.mxu0 %v465_v1  ;;  %417 = vmatpush3.bf16.msra.mxu1 %v468_v3  ;;  %v472_v8 = vld [vmem:[#allocation2 + $0x20] sm:$0xff]   ;;  %v474_v10 = vld [vmem:[#allocation2 + $0x30] sm:$0xff]   ;;  %v475_v11 = vld [vmem:[#allocation2 + $0x38] sm:$0xff]  }
  0x2a   :  { %410 = vmatprep.subr.bf16.mxu0 %v560_v0  ;;  %418 = vmatprep.subr.bf16.mxu1 %v560_v0  ;;  %v476_v12 = vld [vmem:[#allocation5] sm:$0xff]   ;;  %v477_v13 = vld [vmem:[#allocation5 + $0x8] sm:$0xff]   ;;  %v478_v14 = vld [vmem:[#allocation5 + $0x10] sm:$0xff]   ;;  %v59_v20 = vsub.s32 0, %v58_v19  ;;  %v144_v34 = vsub.s32 1, %v58_v19  ;;  %v256_v45 = vsub.s32 2, %v58_v19 }
  0x2b   :  { %v479_v15 = vld [vmem:[#allocation5 + $0x18] sm:$0xff]   ;;  %v480_v16 = vld [vmem:[#allocation5 + $0x20] sm:$0xff]   ;;  %v481_v17 = vld [vmem:[#allocation5 + $0x28] sm:$0xff]  }
  0x2c   :  { %v52_v21 = vld [vmem:[%s671_s4] sm:$0xff]  ;;  %v482_v32 = vld [vmem:[#allocation5 + $0x30] sm:$0xff]   ;;  %v483_v33 = vld [vmem:[#allocation5 + $0x38] sm:$0xff]   ;;  %s562_s4 = smov [#allocation7]  }
  0x2d   :  { %411 = vmatpush3.bf16.msra.mxu0 %v466_v2  ;;  %419 = vmatpush3.bf16.msra.mxu1 %v469_v5  ;;  %v60_v22 = vrot.slane %v52_v21, %v59_v20  ;;  %v145_v35 = vrot.slane %v52_v21, %v144_v34  ;;  %v257_v46 = vrot.slane %v52_v21, %v256_v45  ;;  %s354_s23 = sshll.u32 %s562_s4, 4  ;;  %s355_s23 = int_to_ptr.vmem [resolvable:$true] %s354_s23 }
  0x2e   :  { %436 = vmatprep.subr.bf16.mxu0 %v560_v0  ;;  %420 = vmatprep.subr.bf16.mxu1 %v560_v0  ;;  %s528_s24 = scalar_lea.vmem %s355_s23, 256  ;;  %p533_p3 = scmp.lt.s32.totalorder %s355_s23, %s355_s23 }
  0x2f   :  { %p529_p2 = scmp.ne.s32.totalorder %s355_s23, %s528_s24  ;;  %p534_p4 = scmp.lt.s32.totalorder %s528_s24, %s528_s24 }
  0x30   :  { %413 = vmatmul.mubr.msk.bf16.vlgmr.msra.gmra.mrb[0].mxu0 %vm78_vm1, %v467_v4 }
  0x31   :  { %452 = vmatprep.mubr.msk.bf16.mxu0 %vm561_vm0, %v560_v0  ;;  %421 = vmatpush3.bf16.msra.mxu1 %v470_v6  ;;  %p535_p5 = por %p534_p4, %p533_p3 }
  0x32   :  { %422 = vmatprep.subr.bf16.mxu1 %v560_v0  ;;  %437 = vmatpush3.bf16.msra.mxu0 %v476_v12 }
  0x33   :  { %438 = vmatprep.subr.bf16.mxu0 %v560_v0  ;;  %p536_p6 = pnand %p535_p5, %p529_p2 }
  0x35   :  { %423 = vmatpush3.bf16.msra.mxu1 %v471_v7 }
  0x36   :  { %424 = vmatprep.subr.bf16.mxu1 %v560_v0  ;;  %439 = vmatpush3.bf16.msra.mxu0 %v477_v13 }
  0x37   :  { %440 = vmatprep.subr.bf16.mxu0 %v560_v0 }
  0x39   :  { %425 = vmatpush3.bf16.msra.mxu1 %v472_v8 }
  0x3a   :  { %426 = vmatprep.subr.bf16.mxu1 %v560_v0  ;;  %441 = vmatpush3.bf16.msra.mxu0 %v478_v14 }
  0x3b   :  { %442 = vmatprep.subr.bf16.mxu0 %v560_v0 }
  0x3d   :  { %427 = vmatpush3.bf16.msra.mxu1 %v473_v9 }
  0x3e   :  { %428 = vmatprep.subr.bf16.mxu1 %v560_v0  ;;  %443 = vmatpush3.bf16.msra.mxu0 %v479_v15 }
  0x3f   :  { %444 = vmatprep.subr.bf16.mxu0 %v560_v0 }
  0x41   :  { %429 = vmatpush3.bf16.msra.mxu1 %v474_v10 }
  0x42   :  { %430 = vmatprep.subr.bf16.mxu1 %v560_v0  ;;  %445 = vmatpush3.bf16.msra.mxu0 %v480_v16 }
  0x43   :  { %446 = vmatprep.subr.bf16.mxu0 %v560_v0 }
  0x45   :  { %431 = vmatpush3.bf16.msra.mxu1 %v475_v11 }
  0x46   :  { %447 = vmatpush3.bf16.msra.mxu0 %v481_v17 }
  0x47   :  { %448 = vmatprep.subr.bf16.mxu0 %v560_v0 }
  0x4a   :  { %449 = vmatpush3.bf16.msra.mxu0 %v482_v32 }
  0x4b   :  { %450 = vmatprep.subr.bf16.mxu0 %v560_v0 }
  0x4e   :  { %451 = vmatpush3.bf16.msra.mxu0 %v483_v33 }
 0x103   :  { %v116_v23 = vpop.f32.mrb[0].mxu0 }
 0x104   :  { %v117_v24 = vadd.f32 %v116_v23, %v60_v22  ;;  %v414_v25 = vpop.f32.mrb[1].mxu0 }
 0x105   :  { %v119_v26 = vpop.f32.mrb[2].mxu0 }
 0x106   :  { %v120_v27 = vadd.f32 %v119_v26, %v60_v22  ;;  %v415_v28 = vpop.f32.mrb[3].mxu0  ;;  %v123_v29 = vmax.f32 %v117_v24, 0.0 }
 0x108   :  { %v124_v30 = vmax.f32 %v120_v27, 0.0 }
 0x10a   :  { %v125_v31 = vpack.c.bf16 %v124_v30, %v123_v29 }
 0x10c   :  { %433 = vmatmul.mubr.bf16.vlgmr.msra.gmra.mrb[0].mxu1 %v125_v31 }
 0x1df   :  { %v228_v36 = vpop.f32.mrb[0].mxu1 }
 0x1e0   :  { %v229_v37 = vadd.f32 %v228_v36, %v145_v35  ;;  %v434_v38 = vpop.f32.mrb[1].mxu1 }
 0x1e1   :  { %v231_v39 = vpop.f32.mrb[2].mxu1 }
 0x1e2   :  { %v232_v40 = vadd.f32 %v231_v39, %v145_v35  ;;  %v435_v41 = vpop.f32.mrb[3].mxu1  ;;  %v235_v42 = vmax.f32 %v229_v37, 0.0 }
 0x1e4   :  { %v236_v43 = vmax.f32 %v232_v40, 0.0 }
 0x1e6   :  { %v237_v44 = vpack.c.bf16 %v236_v43, %v235_v42 }
 0x1e8   :  { %453 = vmatmul.mubr.bf16.vlgmr.msra.gmra.mrb[4].mxu0 %v237_v44 }
 0x2bb   :  { %v340_v47 = vpop.f32.mrb[4].mxu0 }
 0x2bc   :  { %v341_v48 = vadd.f32 %v340_v47, %v257_v46  ;;  %v454_v49 = vpop.f32.mrb[5].mxu0 }
 0x2bd   :  { %v343_v50 = vpop.f32.mrb[6].mxu0 }
 0x2be   :  { %347 = vst [vmem:[#allocation7] sm:$0xff] %v341_v48  ;;  %v344_v51 = vadd.f32 %v343_v50, %v257_v46  ;;  %v455_v52 = vpop.f32.mrb[7].mxu0 }
 0x2c0   :  { %348 = vst [vmem:[#allocation7 + $0x8] sm:$0xff] %v344_v51 }
 0x2c1   :  { %539 = shalt.err (!%p536_p6)
}
 0x2c2   :  { %s540_s27 = scalar_lea.hbm %s672_s5, 256 }
 0x2c3   :  { %p541_p7 = scmp.ne.s32.totalorder %s672_s5, %s540_s27  ;;  %p544_p8 = scmp.lt.u32.totalorder %s540_s27, %s672_s5 }
 0x2c5   :  { %p546_p9 = pnand %p544_p8, %p541_p7 }
 0x2c7   :  { %549 = shalt.err (!%p546_p9)
}
 0x2c8   :  { %s563_s7 = smov 128   ;;  %s564_s8 = smov 8  }
 0x2c9   :  { %360 = dma.vmem_to_hbm [thread:$0]  %s355_s23, 256, %s672_s5, [#allocation4], %s563_s7, %s563_s7, %s564_s8  }
 0x2ca   :  { %554 = dma.done.wait [#allocation4], 256  }
 0x2cb   :  { %555 = vsyncadd [#allocation4], 4294967040 }
 0x2cc   :  { %364 = vsyncpa [#allocation3], 1 }
 0x2cd   :  { %365 = vsyncpa [#allocation6], 1 }
 0x2ce   :  { %366 = vsyncpa [#allocation4], 1 }

</bundles_post_ra>
